<compile_context>
chip_gen: v6e
topology: v6e:2x2x1
jax: 0.10.0
libtpu: 0.0.40
codegen_flags: <defaults>
</compile_context>

<pallas_src>
import jax
import jax.numpy as jnp
from jax.experimental import pallas as pl
from jax.experimental.pallas import tpu as pltpu


def _round_up(a: int, b: int) -> int:
    return ((a + b - 1) // b) * b


def _physical_vmem_bytes() -> int:
    """Per-core VMEM capacity; conservative fallback if the query fails."""
    try:
        info = pltpu.get_tpu_info()
        v = getattr(info, "vmem_capacity_bytes", None)
        if v:
            return int(v)
    except Exception:
        pass
    return 64 * 1024 * 1024  # v7x per-TC value; v5e/v6e actually have 128 MiB.


def _matmul_kernel_noacc(x_ref, w_ref, o_ref):
    """K un-tiled (grid_k == 1): one MXU pass per output tile, no scratch."""
    o_ref[...] = jnp.dot(
        x_ref[...], w_ref[...], preferred_element_type=jnp.float32
    ).astype(o_ref.dtype)


def _matmul_kernel_acc(x_ref, w_ref, o_ref, acc_ref):
    """K tiled over grid axis 2 with an f32 VMEM accumulator."""

    @pl.when(pl.program_id(2) == 0)
    def _init():
        acc_ref[...] = jnp.zeros_like(acc_ref)

    acc_ref[...] += jnp.dot(
        x_ref[...], w_ref[...], preferred_element_type=jnp.float32
    )

    @pl.when(pl.program_id(2) == pl.num_programs(2) - 1)
    def _finalize():
        o_ref[...] = acc_ref[...].astype(o_ref.dtype)


class StaticMatrix:
    """Pallas-TPU equivalent of the torch StaticMatrix module (y = x @ matrix).

    The weight is a fixed buffer, so the K/N tiling plan and any weight-side
    zero padding are computed once at construction; per-call work touches only
    x and the output.
    """

    def __init__(self, matrix, *, weight_budget_bytes=None, max_untiled_k=2048):
        matrix = jnp.asarray(matrix)
        if matrix.ndim != 2:
            raise ValueError("matrix must be 2-D (K, N)")
        self.K, self.N = int(matrix.shape[0]), int(matrix.shape[1])
        self.w_dtype = matrix.dtype
        w_item = jnp.dtype(self.w_dtype).itemsize

        self._phys = _physical_vmem_bytes()
        # Total working-set budget (leave headroom for Mosaic internal scratch).
        self._budget_total = min(int(self._phys * 0.6), 64 * 1024 * 1024)
        if weight_budget_bytes is None:
            # ~9.6 MiB on v7x (64 MiB VMEM), 16 MiB on v5e/v6e.
            weight_budget_bytes = min(16 * 1024 * 1024, self._budget_total // 4)

        K, N = self.K, self.N
        if K * N * w_item <= weight_budget_bytes:
            # Resident-weight fast path: whole matrix stays in VMEM for the
            # entire grid; x and the output stream through HBM exactly once.
            tile_k, k_pad = K, K
            tile_n, n_pad = N, N
        else:
            # N: lane-dense tiles; prefer 256-wide (MXU is 256 wide on v6e/v7x).
            if _round_up(N, 128) <= 128:
                n_pad = _round_up(N, 128)
                tile_n = n_pad
            else:
                n_pad = _round_up(N, 256)
                tile_n = 512 if (w_item <= 2 and n_pad % 512 == 0) else 256
            # K: avoid padding. Keep un-tiled up to max_untiled_k; otherwise
            # prefer a 128-multiple divisor of K; pad only as a last resort.
            if K <= max_untiled_k:
                tile_k, k_pad = K, K
            else:
                tile_k = 0
                hi = max(128, (min(max_untiled_k, K) // 128) * 128)
                for cand in range(hi, 127, -128):
                    if K % cand == 0:
                        tile_k = cand
                        break
                if tile_k:
                    k_pad = K
                else:
                    tile_k = hi
                    k_pad = _round_up(K, tile_k)

        self.tile_k, self.k_pad = tile_k, k_pad
        self.tile_n, self.n_pad = tile_n, n_pad
        self.grid_n = n_pad // tile_n
        self.grid_k = k_pad // tile_k

        # One-time weight prep: zero-pad only the tiled K/N tails (the K
        # padding is required for reduction correctness; N padding keeps the
        # weight blocks lane-dense). Done once here, never per forward call.
        if (k_pad, n_pad) != (K, N):
            matrix = jnp.pad(matrix, ((0, k_pad - K), (0, n_pad - N)))
        self.w = matrix

    # ------------------------------------------------------------------ #

    def __call__(self, x, *, tile_m=None):
        *lead, K = x.shape
        if K != self.K:
            raise ValueError(f"inner dims mismatch: {K} vs {self.K}")

        # Keep operands in their native dtypes; the MXU sees bf16 inputs with
        # an f32 accumulator. Only the output uses the promoted result dtype.
        # TODO(synk): integer inputs follow float promotion/accumulation here,
        # not torch's exact integer matmul.
        out_dtype = jnp.result_type(x.dtype, self.w_dtype)
        x2d = x.reshape(-1, K)
        M = x2d.shape[0]

        x_item = jnp.dtype(x2d.dtype).itemsize
        w_item = jnp.dtype(self.w_dtype).itemsize
        o_item = jnp.dtype(out_dtype).itemsize
        sub = {4: 8, 2: 16, 1: 32}.get(x_item, 8)

        if tile_m is None:
            tile_m = 512 if x_item >= 4 else 1024
        tile_m = min(tile_m, _round_up(M, sub))
        tile_m = max(sub, _round_up(tile_m, sub))

        def vmem_need(tm):
            need = 2 * tm * self.tile_k * x_item            # x, double-buffered
            need += 2 * self.tile_k * self.tile_n * w_item  # weight buffers
            need += 2 * tm * self.tile_n * o_item           # out, double-buffered
            if self.grid_k > 1:
                need += tm * self.tile_n * 4                # f32 accumulator
            return need

        # Shrink tile_m until the working set fits the per-chip VMEM budget
        # (prevents v6e-sized tiles from overflowing v7x's 64 MiB per-TC VMEM).
        while vmem_need(tile_m) > self._budget_total and tile_m > sub:
            tile_m = max(sub, _round_up(tile_m // 2, sub))

        grid_m = pl.cdiv(M, tile_m)
        grid = (grid_m, self.grid_n, self.grid_k)

        # Only the K reduction tail ever needs zero padding of x (garbage in
        # the reduction would corrupt valid outputs). The M tail is handled by
        # Pallas' masked boundary blocks - no full-array pad copy of x.
        if self.k_pad != K:
            x2d = jnp.pad(x2d, ((0, 0), (0, self.k_pad - K)))

        x_spec = pl.BlockSpec((tile_m, self.tile_k), lambda i, j, k: (i, k))
        # With grid_n == grid_k == 1 (resident-weight path) this index map is
        # constant, so the weight is DMA'd from HBM exactly once.
        w_spec = pl.BlockSpec((self.tile_k, self.tile_n), lambda i, j, k: (k, j))
        out_spec = pl.BlockSpec((tile_m, self.tile_n), lambda i, j, k: (i, j))

        if self.grid_k > 1:
            kernel = _matmul_kernel_acc
            scratch = [pltpu.VMEM((tile_m, self.tile_n), jnp.float32)]
        else:
            kernel = _matmul_kernel_noacc
            scratch = []

        # Always set the scoped-VMEM limit from the computed need (the default
        # is only 16 MiB on v5e / 32 MiB on v6e+v7x), capped below physical.
        vmem_limit = int(
            min(max(vmem_need(tile_m) * 1.3, 32 * 1024 * 1024),
                self._phys * 0.75)
        )

        cost = pl.CostEstimate(
            flops=2 * M * self.K * self.N,
            transcendentals=0,
            bytes_accessed=(M * self.k_pad * x_item
                            + self.k_pad * self.n_pad * w_item
                            + M * self.N * o_item),
        )

        out2d = pl.pallas_call(
            kernel,
            out_shape=jax.ShapeDtypeStruct((M, self.N), out_dtype),
            grid_spec=pltpu.PrefetchScalarGridSpec(
                num_scalar_prefetch=0,
                grid=grid,
                in_specs=[x_spec, w_spec],
                out_specs=out_spec,
                scratch_shapes=scratch,
            ),
            compiler_params=pltpu.CompilerParams(
                dimension_semantics=("parallel", "parallel", "arbitrary"),
                vmem_limit_bytes=vmem_limit,
            ),
            cost_estimate=cost,
        )(x2d, self.w)

        return out2d.reshape(*lead, self.N)


def static_matrix_matmul(x, matrix, **kwargs):
    """One-shot convenience wrapper (prefer StaticMatrix for repeated calls)."""
    return StaticMatrix(matrix)(x, **kwargs)


if __name__ == "__main__":
    key = jax.random.PRNGKey(0)
    kx, km, kx2, km2, kx3, km3 = jax.random.split(key, 6)

    # 1) Small shapes consistent with the forward: batch=2, seq=8, hidden=32.
    B, S, H = 2, 8, 32
    x = jax.random.normal(kx, (B, S, H), dtype=jnp.float32)
    matrix = jax.random.normal(km, (H, H), dtype=jnp.float32)   # registered buffer
    mod = StaticMatrix(matrix)           # weight prep hoisted to construction
    out = jax.block_until_ready(mod(x))
    ref = x @ matrix
    assert out.shape == ref.shape == (B, S, H)
    assert jnp.allclose(out, ref, atol=1e-5, rtol=1e-5)

    # 2) Resident-weight path at a larger, non-square shape (M tail masked).
    x_big = jax.random.normal(kx2, (2, 100, 640), dtype=jnp.float32)
    w_big = jax.random.normal(km2, (640, 384), dtype=jnp.float32)
    out_big = jax.block_until_ready(StaticMatrix(w_big)(x_big))
    ref_big = x_big @ w_big
    assert out_big.shape == ref_big.shape == (2, 100, 384)
    assert jnp.allclose(out_big, ref_big, atol=1e-2, rtol=1e-2)

    # 3) Force the tiled path (K reduced over 5 grid steps, tiled N with a
    #    masked output tail) to exercise the accumulator kernel.
    mod_tiled = StaticMatrix(w_big, weight_budget_bytes=0, max_untiled_k=256)
    out_tiled = jax.block_until_ready(mod_tiled(x_big))
    assert out_tiled.shape == ref_big.shape
    assert jnp.allclose(out_tiled, ref_big, atol=1e-2, rtol=1e-2)

    # 4) bf16 operands stay bf16 on the MXU (f32 accumulation, bf16 output).
    x_bf = jax.random.normal(kx3, (2, 8, 256), dtype=jnp.bfloat16)
    w_bf = jax.random.normal(km3, (256, 128), dtype=jnp.bfloat16)
    out_bf = jax.block_until_ready(StaticMatrix(w_bf)(x_bf))
    ref_bf = jnp.dot(x_bf.astype(jnp.float32), w_bf.astype(jnp.float32))
    assert out_bf.dtype == jnp.bfloat16
    assert jnp.allclose(out_bf.astype(jnp.float32), ref_bf, atol=1e-1, rtol=2e-2)

    print("KERNEL_OK")
</pallas_src>

<mosaic_0001>
module attributes {stable_mosaic.version = 11 : i64} {
  func.func @_matmul_kernel_noacc(%arg0: i32, %arg1: i32, %arg2: i32, %arg3: memref<16x32xf32, #tpu.memory_space<vmem>>, %arg4: memref<32x32xf32, #tpu.memory_space<vmem>>, %arg5: memref<16x32xf32, #tpu.memory_space<vmem>>) attributes {dimension_semantics = [#tpu.dimension_semantics<parallel>, #tpu.dimension_semantics<parallel>, #tpu.dimension_semantics<arbitrary>], iteration_bounds = array<i64: 1, 1, 1>, scalar_prefetch = 0 : i64, scratch_operands = 0 : i64, tpu.core_type = #tpu.core_type<tc>, window_params = [{transform_indices = @transform_0, window_bounds = array<i64: 16, 32>}, {transform_indices = @transform_1, window_bounds = array<i64: 32, 32>}, {transform_indices = @transform_2, window_bounds = array<i64: 16, 32>}]} {
    %c0 = arith.constant 0 : index
    %c0_0 = arith.constant 0 : index
    %0 = vector.load %arg3[%c0, %c0_0] : memref<16x32xf32, #tpu.memory_space<vmem>>, vector<16x32xf32>
    %c0_1 = arith.constant 0 : index
    %c0_2 = arith.constant 0 : index
    %1 = vector.load %arg4[%c0_1, %c0_2] : memref<32x32xf32, #tpu.memory_space<vmem>>, vector<32x32xf32>
    %cst = arith.constant dense<0.000000e+00> : vector<16x32xf32>
    %2 = tpu.matmul %0, %1, %cst {dimension_numbers = #tpu.dot_dimension_numbers<[1], [0], [0], [1], [0, 0, 1, 1], [], []>} : vector<16x32xf32>, vector<32x32xf32>, vector<16x32xf32> -> vector<16x32xf32>
    %c0_3 = arith.constant 0 : index
    %c0_4 = arith.constant 0 : index
    %3 = vector.load %arg5[%c0_3, %c0_4] : memref<16x32xf32, #tpu.memory_space<vmem>>, vector<16x32xf32>
    tpu.vector_store %arg5[%c0_3, %c0_4], %2 {strides = array<i32>} : memref<16x32xf32, #tpu.memory_space<vmem>>, vector<16x32xf32>,
    return
  }
  func.func @transform_0(%arg0: i32, %arg1: i32, %arg2: i32) -> (i32, i32) {
    %c0_i32 = arith.constant 0 : i32
    return %arg0, %arg2 : i32, i32
  }
  func.func @transform_1(%arg0: i32, %arg1: i32, %arg2: i32) -> (i32, i32) {
    %c0_i32 = arith.constant 0 : i32
    return %arg2, %arg1 : i32, i32
  }
  func.func @transform_2(%arg0: i32, %arg1: i32, %arg2: i32) -> (i32, i32) {
    %c0_i32 = arith.constant 0 : i32
    return %arg0, %arg1 : i32, i32
  }
}

</mosaic_0001>

<bundles_post_ra>
// kernel: tpu_custom_call.1
= control target key start
LH: loop header
LB: loop body
LE: loop exit
PB: predicated region body
PF: predicated region fallthrough
CT: control target
= control target key end

     0   :  { %7 = vsyncpa [#allocation3], 0  ;;  %s280_s0 = inlined_call_operand.hbm [shape: f32[16,32], index: 0, kind: input, shape index: {}]   ;;  %s281_s1 = inlined_call_operand.hbm [shape: f32[32,32], index: 1, kind: input, shape index: {}]   ;;  %s282_s2 = inlined_call_operand.hbm [shape: f32[16,32], index: 2, kind: output, shape index: {}]  }
   0x1   :  { %8 = vsyncpa [#allocation6], 0 }
   0x2   :  { %9 = vsyncpa [#allocation4], 0  ;;  %s238_s9 = smov [#allocation2]  }
   0x3   :  { %s15_s10 = sshll.u32 %s238_s9, 4  ;;  %s16_s10 = int_to_ptr.vmem [resolvable:$true] %s15_s10 }
   0x4   :  { %s180_s11 = scalar_lea.vmem %s16_s10, 256  ;;  %p185_p1 = scmp.lt.s32.totalorder %s16_s10, %s16_s10 }
   0x5   :  { %p181_p0 = scmp.ne.s32.totalorder %s16_s10, %s180_s11  ;;  %p186_p2 = scmp.lt.s32.totalorder %s180_s11, %s180_s11 }
   0x7   :  { %p187_p3 = por %p186_p2, %p185_p1 }
   0x9   :  { %p188_p4 = pnand %p187_p3, %p181_p0 }
   0xb   :  { %191 = shalt.err (!%p188_p4)
}
   0xc   :  { %s239_s12 = smov 128   ;;  %s240_s13 = smov 8  }
   0xd   :  { %21 = dma.hbm_to_vmem [thread:$0]  %s280_s0, 256, %s16_s10, [#allocation3], %s239_s12, %s239_s12, %s240_s13  }
   0xe   :  { %s241_s16 = smov [#allocation5]  }
   0xf   :  { %s27_s17 = sshll.u32 %s241_s16, 4  ;;  %s28_s17 = int_to_ptr.vmem [resolvable:$true] %s27_s17 }
  0x10   :  { %s200_s18 = scalar_lea.vmem %s28_s17, 512  ;;  %p205_p6 = scmp.lt.s32.totalorder %s28_s17, %s28_s17 }
  0x11   :  { %p201_p5 = scmp.ne.s32.totalorder %s28_s17, %s200_s18  ;;  %p206_p7 = scmp.lt.s32.totalorder %s200_s18, %s200_s18 }
  0x13   :  { %p207_p8 = por %p206_p7, %p205_p6 }
  0x15   :  { %p208_p9 = pnand %p207_p8, %p201_p5 }
  0x17   :  { %211 = shalt.err (!%p208_p9)
}
  0x18   :  { %33 = dma.hbm_to_vmem [thread:$0]  %s281_s1, 512, %s28_s17, [#allocation6], %s239_s12, %s239_s12, %s240_s13  }
  0x19   :  { %232 = dma.done.wait [#allocation3], 256  }
  0x1a   :  { %233 = vsyncadd [#allocation3], 4294967040 }
  0x1b   :  { %234 = dma.done.wait [#allocation6], 512  }
  0x1c   :  { %235 = vsyncadd [#allocation6], 4294966784  ;;  %vm46_vm0 = vcmask 261120   ;;  %v45_v0 = vld [vmem:[#allocation5 + $0x18] sm:$0xff]  ;;  %v44_v1 = vld [vmem:[#allocation5 + $0x10] sm:$0xff]  ;;  %s242_s0 = smov [#allocation7]  }
  0x1d   :  { %156 = vmatprep.subr.mxu0 %v45_v0  ;;  %v40_v2 = vld [vmem:[#allocation2] sm:$0xff]  ;;  %v43_v3 = vld [vmem:[#allocation5 + $0x8] sm:$0xff]  ;;  %v42_v4 = vld [vmem:[#allocation5] sm:$0xff]  ;;  %s135_s1 = sshll.u32 %s242_s0, 4  ;;  %s136_s1 = int_to_ptr.vmem [resolvable:$true] %s135_s1 }
  0x1e   :  { %157 = vmatpush3.msra.mxu0 %v45_v0  ;;  %164 = vmatprep.mubr.msk.f32.mxu0 %vm46_vm0, %v40_v2  ;;  %v41_v5 = vld [vmem:[#allocation2 + $0x8] sm:$0xff]  ;;  %s212_s21 = scalar_lea.vmem %s136_s1, 256  ;;  %p217_p11 = scmp.lt.s32.totalorder %s136_s1, %s136_s1 }
  0x1f   :  { %158 = vmatprep.subr.mxu0 %v44_v1  ;;  %p213_p10 = scmp.ne.s32.totalorder %s136_s1, %s212_s21  ;;  %p218_p12 = scmp.lt.s32.totalorder %s212_s21, %s212_s21 }
  0x20   :  { %159 = vmatpush3.msra.mxu0 %v44_v1 }
  0x21   :  { %160 = vmatprep.subr.mxu0 %v43_v3  ;;  %p219_p13 = por %p218_p12, %p217_p11 }
  0x22   :  { %161 = vmatpush3.msra.mxu0 %v43_v3 }
  0x23   :  { %162 = vmatprep.subr.mxu0 %v42_v4  ;;  %p220_p0 = pnand %p219_p13, %p213_p10 }
  0x24   :  { %163 = vmatpush3.msra.mxu0 %v42_v4 }
  0x25   :  { %165 = vmatmul.mubr.msk.f32.vlgmr.msra.gmra.mxu0 %vm46_vm0, %v41_v5 }
  0xe5   :  { %v166_v6 = vpop.f32.mrf.mxu0 }
  0xe6   :  { %129 = vst.msk [vmem:[#allocation7 + $0x8] sm:$0xff] %vm46_vm0, %v166_v6 }
  0xe7   :  { %v119_v7 = vpop.f32.mrf.mxu0 }
  0xe8   :  { %128 = vst.msk [vmem:[#allocation7] sm:$0xff] %vm46_vm0, %v119_v7 }
  0xe9   :  { %223 = shalt.err (!%p220_p0)
}
  0xea   :  { %141 = dma.vmem_to_hbm [thread:$0]  %s136_s1, 256, %s282_s2, [#allocation4], %s239_s12, %s239_s12, %s240_s13  }
  0xeb   :  { %236 = dma.done.wait [#allocation4], 256  }
  0xec   :  { %237 = vsyncadd [#allocation4], 4294967040 }
  0xed   :  { %145 = vsyncpa [#allocation3], 1 }
  0xee   :  { %146 = vsyncpa [#allocation6], 1 }
  0xef   :  { %147 = vsyncpa [#allocation4], 1 }

</bundles_post_ra>
